<compile_context>
chip_gen: v7x
topology: tpu7x:2x2x1
jax: 0.10.0
libtpu: 0.0.40
codegen_flags: <defaults>
</compile_context>

<pallas_src>
import functools

import numpy as np
import jax
import jax.numpy as jnp
from jax.experimental import pallas as pl
from jax.experimental.pallas import tpu as pltpu


# Per-input-buffer VMEM tile budget (bytes).  The Pallas pipeline double
# buffers each input, so the input working set is ~2x this (~8 MiB): it fits
# v5e's 16 MiB default scoped VMEM and stays far under v7x's 64 MiB physical
# VMEM per TensorCore, while tiles stay big enough (>=512 rows / >=128 lanes)
# to amortize the ~0.35us per-grid-step overhead.
_TILE_BYTES = 4 * 1024 * 1024
_TM_TARGET = 512
_VMEM_LIMIT = 32 * 1024 * 1024


def _sublane_multiple(dtype):
    # Second-to-last block dim must be a multiple of this (or the full dim).
    return {4: 8, 2: 16, 1: 32}.get(jnp.dtype(dtype).itemsize, 8)


def _mean_last_kernel(x_ref, o_ref, acc_ref, *, inv_r):
    """Reduce the last (lane) axis of a (TM, TR) block into a (TM, 1) f32 acc."""
    k = pl.program_id(1)

    @pl.when(k == 0)
    def _init():
        acc_ref[...] = jnp.zeros_like(acc_ref)

    x = x_ref[...].astype(jnp.float32)
    acc_ref[...] += jnp.sum(x, axis=-1, keepdims=True)

    @pl.when(k == pl.num_programs(1) - 1)
    def _finalize():
        o_ref[...] = (acc_ref[...] * inv_r).astype(o_ref.dtype)


def _mean_last_axis(x2, out_dtype, tile_bytes):
    """Mean over the last axis of x2:(M, R) -> (M,)."""
    M, R = x2.shape
    itemsize = x2.dtype.itemsize

    # Row tile: full dim if small, else a 512-row tile (multiple of 8/16/32).
    TM = M if M <= _TM_TARGET else _TM_TARGET

    # Reduction tile: multiple of 128 lanes (or the full dim).
    r_cap = max(128, (tile_bytes // max(1, TM * itemsize)) // 128 * 128)
    if R <= r_cap:
        TR = R
    else:
        TR = None
        t = r_cap
        while t >= 128:                     # prefer an aligned divisor: no padding
            if R % t == 0:
                TR = t
                break
            t -= 128
        if TR is None:
            # No aligned divisor: zero-pad R (we divide by the TRUE R below).
            TR = r_cap
            r_pad_len = pl.cdiv(R, TR) * TR
            x2 = jnp.pad(x2, ((0, 0), (0, r_pad_len - R)))

    R_pad = x2.shape[1]
    grid = (pl.cdiv(M, TM), pl.cdiv(R_pad, TR))

    out = pl.pallas_call(
        functools.partial(_mean_last_kernel, inv_r=1.0 / R),
        out_shape=jax.ShapeDtypeStruct((M, 1), out_dtype),
        grid_spec=pltpu.PrefetchScalarGridSpec(
            num_scalar_prefetch=0,
            grid=grid,
            in_specs=[pl.BlockSpec((TM, TR), lambda i, k: (i, k))],
            out_specs=pl.BlockSpec((TM, 1), lambda i, k: (i, 0)),
            scratch_shapes=[pltpu.VMEM((TM, 1), jnp.float32)],
        ),
        compiler_params=pltpu.CompilerParams(
            dimension_semantics=("parallel", "arbitrary"),
            vmem_limit_bytes=_VMEM_LIMIT,
        ),
        cost_estimate=pl.CostEstimate(
            flops=M * R,
            transcendentals=0,
            bytes_accessed=M * R_pad * itemsize + M * jnp.dtype(out_dtype).itemsize,
        ),
    )(x2)
    return out[:, 0]


def _mean_mid_kernel(x_ref, o_ref, *, inv_r):
    """Reduce the middle axis of a (TP, R, TQ) block -> lane-dense (TP, TQ)."""
    x = x_ref[...].astype(jnp.float32)
    o_ref[...] = (jnp.sum(x, axis=1) * inv_r).astype(o_ref.dtype)


def _mean_middle_axis(x3, out_dtype, tile_bytes):
    """Mean over the middle axis of x3:(P, R, Q) -> (P, Q); None if it won't tile."""
    P, R, Q = x3.shape
    itemsize = x3.dtype.itemsize
    sub = _sublane_multiple(out_dtype)

    TQ = Q if Q <= 2048 else 2048           # full dim or multiple of 128 lanes
    tp = tile_bytes // max(1, R * TQ * itemsize)
    if tp >= P:
        TP = P                               # full dim: exempt from (8, 128) rule
    else:
        TP = max(sub, (tp // sub) * sub)     # keep sublane packing alignment
    if TP * R * TQ * itemsize > 2 * tile_bytes:
        return None                          # whole-R rows too big: caller falls back

    grid = (pl.cdiv(P, TP), pl.cdiv(Q, TQ))
    out = pl.pallas_call(
        functools.partial(_mean_mid_kernel, inv_r=1.0 / R),
        out_shape=jax.ShapeDtypeStruct((P, Q), out_dtype),
        grid_spec=pltpu.PrefetchScalarGridSpec(
            num_scalar_prefetch=0,
            grid=grid,
            in_specs=[pl.BlockSpec((TP, R, TQ), lambda p, q: (p, 0, q))],
            out_specs=pl.BlockSpec((TP, TQ), lambda p, q: (p, q)),
        ),
        compiler_params=pltpu.CompilerParams(
            dimension_semantics=("parallel", "parallel"),
            vmem_limit_bytes=_VMEM_LIMIT,
        ),
        cost_estimate=pl.CostEstimate(
            flops=P * R * Q,
            transcendentals=0,
            bytes_accessed=P * R * Q * itemsize + P * Q * jnp.dtype(out_dtype).itemsize,
        ),
    )(x3)
    return out


def pallas_mean(x, dim, *, tile_bytes=_TILE_BYTES):
    """Equivalent of torch.mean(x, dim=dim) (keepdim=False)."""
    ndim = x.ndim
    dims = sorted(set(d % ndim for d in dim))
    if not dims:
        return x
    keep = [d for d in range(ndim) if d not in dims]
    keep_shape = tuple(x.shape[d] for d in keep)
    R = int(np.prod([x.shape[d] for d in dims]))
    M = int(np.prod(keep_shape)) if keep_shape else 1

    # torch.mean rejects integer inputs; we promote them to f32 output instead.
    out_dtype = x.dtype if jnp.issubdtype(x.dtype, jnp.floating) else jnp.float32

    contiguous = (dims[-1] - dims[0] + 1) == len(dims)

    if contiguous and dims[-1] == ndim - 1:
        # Reduced axes already trailing (dim=[2,3] on NCHW): reshape is free.
        out = _mean_last_axis(x.reshape(M, R), out_dtype, tile_bytes)
        return out.reshape(keep_shape)

    if contiguous:
        # Contiguous middle block (e.g. dim=[1] on NCHW): reduce the middle axis
        # in-kernel instead of paying an XLA transpose (extra HBM round trip).
        P = int(np.prod(x.shape[: dims[0]])) if dims[0] > 0 else 1
        Q = int(np.prod(x.shape[dims[-1] + 1:]))
        out = _mean_middle_axis(x.reshape(P, R, Q), out_dtype, tile_bytes)
        if out is not None:
            return out.reshape(keep_shape)

    # TODO(synk): non-contiguous reduce dims (or oversized middle-axis rows)
    # still pay one XLA transpose (an extra HBM round trip) before the kernel.
    xt = jnp.transpose(x, keep + dims)
    out = _mean_last_axis(xt.reshape(M, R), out_dtype, tile_bytes)
    return out.reshape(keep_shape)


if __name__ == "__main__":
    key = jax.random.PRNGKey(0)
    # _Mean(dim=[2, 3]) -> global average pool over spatial dims of NCHW input.
    x = jax.random.normal(key, (2, 4, 16, 16), dtype=jnp.float32)

    # 1) Canonical path: trailing reduce dims.
    y = jax.block_until_ready(pallas_mean(x, dim=[2, 3]))
    y_ref = jnp.mean(x, axis=(2, 3))
    assert y.shape == y_ref.shape == (2, 4)
    np.testing.assert_allclose(np.asarray(y), np.asarray(y_ref), rtol=1e-5, atol=1e-5)

    # 2) Force a multi-step reduction grid (exercises the f32 accumulator and
    #    pl.when init/finalize pipeline) with the same small input.
    y2 = jax.block_until_ready(pallas_mean(x, dim=[2, 3], tile_bytes=8 * 128 * 4))
    np.testing.assert_allclose(np.asarray(y2), np.asarray(y_ref), rtol=1e-5, atol=1e-5)

    # 3) Non-trailing contiguous reduce dim: middle-axis kernel, no wrapper transpose.
    y3 = jax.block_until_ready(pallas_mean(x, dim=[1]))
    np.testing.assert_allclose(np.asarray(y3), np.asarray(jnp.mean(x, axis=1)),
                               rtol=1e-5, atol=1e-5)

    # 4) Non-contiguous reduce dims: transpose fallback path.
    y4 = jax.block_until_ready(pallas_mean(x, dim=[1, 3]))
    np.testing.assert_allclose(np.asarray(y4), np.asarray(jnp.mean(x, axis=(1, 3))),
                               rtol=1e-5, atol=1e-5)

    print("KERNEL_OK")
</pallas_src>

<mosaic_0001>
module attributes {stable_mosaic.version = 11 : i64} {
  func.func @_mean_last_kernel(%arg0: i32, %arg1: i32, %arg2: memref<8x256xf32, #tpu.memory_space<vmem>>, %arg3: memref<8x1xf32, #tpu.memory_space<vmem>>, %arg4: memref<8x1xf32, #tpu.memory_space<vmem>>) attributes {dimension_semantics = [#tpu.dimension_semantics<parallel>, #tpu.dimension_semantics<arbitrary>], iteration_bounds = array<i64: 1, 1>, scalar_prefetch = 0 : i64, scratch_operands = 1 : i64, tpu.core_type = #tpu.core_type<tc>, window_params = [{transform_indices = @transform_0, window_bounds = array<i64: 8, 256>}, {transform_indices = @transform_1, window_bounds = array<i64: 8, 1>}]} {
    %c0_i32 = arith.constant 0 : i32
    %0 = arith.cmpi eq, %arg1, %c0_i32 : i32
    %1 = arith.extui %0 : i1 to i32
    %c0_i32_0 = arith.constant 0 : i32
    %2 = arith.cmpi ne, %1, %c0_i32_0 : i32
    scf.if %2 {
      %cst_8 = arith.constant 0.000000e+00 : f32
      %12 = vector.broadcast %cst_8 : f32 to vector<8x1xf32>
      %c0_9 = arith.constant 0 : index
      %c0_10 = arith.constant 0 : index
      %13 = vector.load %arg4[%c0_9, %c0_10] : memref<8x1xf32, #tpu.memory_space<vmem>>, vector<8x1xf32>
      tpu.vector_store %arg4[%c0_9, %c0_10], %12 {strides = array<i32>} : memref<8x1xf32, #tpu.memory_space<vmem>>, vector<8x1xf32>,
    } else {
    }
    %c0 = arith.constant 0 : index
    %c0_1 = arith.constant 0 : index
    %3 = vector.load %arg2[%c0, %c0_1] : memref<8x256xf32, #tpu.memory_space<vmem>>, vector<8x256xf32>
    %c0_2 = arith.constant 0 : index
    %c0_3 = arith.constant 0 : index
    %4 = vector.load %arg4[%c0_2, %c0_3] : memref<8x1xf32, #tpu.memory_space<vmem>>, vector<8x1xf32>
    %cst = arith.constant dense<0.000000e+00> : vector<8xf32>
    %5 = vector.multi_reduction <add>, %3, %cst [1] : vector<8x256xf32> to vector<8xf32>
    %6 = vector.shape_cast %5 : vector<8xf32> to vector<8x1xf32>
    %7 = arith.addf %4, %6 : vector<8x1xf32>
    %c0_4 = arith.constant 0 : index
    %c0_5 = arith.constant 0 : index
    %8 = vector.load %arg4[%c0_4, %c0_5] : memref<8x1xf32, #tpu.memory_space<vmem>>, vector<8x1xf32>
    tpu.vector_store %arg4[%c0_4, %c0_5], %7 {strides = array<i32>} : memref<8x1xf32, #tpu.memory_space<vmem>>, vector<8x1xf32>,
    %c0_i32_6 = arith.constant 0 : i32
    %9 = arith.cmpi eq, %arg1, %c0_i32_6 : i32
    %10 = arith.extui %9 : i1 to i32
    %c0_i32_7 = arith.constant 0 : i32
    %11 = arith.cmpi ne, %10, %c0_i32_7 : i32
    scf.if %11 {
      %c0_8 = arith.constant 0 : index
      %c0_9 = arith.constant 0 : index
      %12 = vector.load %arg4[%c0_8, %c0_9] : memref<8x1xf32, #tpu.memory_space<vmem>>, vector<8x1xf32>
      %cst_10 = arith.constant 3.906250e-03 : f32
      %13 = vector.broadcast %cst_10 : f32 to vector<8x1xf32>
      %14 = arith.mulf %12, %13 : vector<8x1xf32>
      %c0_11 = arith.constant 0 : index
      %c0_12 = arith.constant 0 : index
      %15 = vector.load %arg3[%c0_11, %c0_12] : memref<8x1xf32, #tpu.memory_space<vmem>>, vector<8x1xf32>
      tpu.vector_store %arg3[%c0_11, %c0_12], %14 {strides = array<i32>} : memref<8x1xf32, #tpu.memory_space<vmem>>, vector<8x1xf32>,
    } else {
    }
    return
  }
  func.func @transform_0(%arg0: i32, %arg1: i32) -> (i32, i32) {
    %c0_i32 = arith.constant 0 : i32
    return %arg0, %arg1 : i32, i32
  }
  func.func @transform_1(%arg0: i32, %arg1: i32) -> (i32, i32) {
    %c0_i32 = arith.constant 0 : i32
    %c0_i32_0 = arith.constant 0 : i32
    return %arg0, %c0_i32 : i32, i32
  }
}

</mosaic_0001>

<bundles_post_ra>
// kernel: tpu_custom_call.1
= control target key start
LH: loop header
LB: loop body
LE: loop exit
PB: predicated region body
PF: predicated region fallthrough
CT: control target
= control target key end

     0   :  { %6 = vsyncpa [#allocation4], 0  ;;  %s72_s6 = smov [#allocation3]   ;;  %s99_s0 = inlined_call_operand.hbm [shape: f32[8,256], index: 0, kind: input, shape index: {}]   ;;  %s100_s1 = inlined_call_operand.vmem [shape: f32[8,1], index: 1, kind: output, shape index: {}]  }
   0x1   :  { %s13_s7 = sshll.u32 %s72_s6, 4  ;;  %s48_s10 = scalar_lea.hbm %s99_s0, 256  ;;  %s14_s7 = int_to_ptr.vmem [resolvable:$true] %s13_s7 }
   0x2   :  { %p49_p0 = scmp.ne.s32.totalorder %s99_s0, %s48_s10  ;;  %p52_p1 = scmp.lt.u32.totalorder %s48_s10, %s99_s0 }
   0x4   :  { %p54_p2 = pnand %p52_p1, %p49_p0 }
   0x6   :  { %57 = shalt.err (!%p54_p2)
}
   0x7   :  { %s58_s15 = scalar_lea.vmem %s14_s7, 256  ;;  %p63_p4 = scmp.lt.s32.totalorder %s14_s7, %s14_s7 }
   0x8   :  { %p59_p3 = scmp.ne.s32.totalorder %s14_s7, %s58_s15  ;;  %p64_p5 = scmp.lt.s32.totalorder %s58_s15, %s58_s15 }
   0xa   :  { %p65_p6 = por %p64_p5, %p63_p4 }
   0xc   :  { %p66_p7 = pnand %p65_p6, %p59_p3 }
   0xe   :  { %69 = shalt.err (!%p66_p7)
}
   0xf   :  { %16 = dma.hbm_to_vmem [thread:$0]  %s99_s0, 256, %s14_s7, [#allocation4]  }
  0x10   :  { %70 = dma.done.wait [#allocation4], 256  }
  0x11   :  { %71 = vsyncadd [#allocation4], 4294967040  ;;  %vm24_vm0 = vcmask 7168   ;;  %v73_v0 = vmov 0.0   ;;  %v26_v1 = vld [vmem:[#allocation3] sm:$0xff]  ;;  %v27_v2 = vld [vmem:[#allocation3 + $0x8] sm:$0xff] }
  0x12   :  { %25 = vst.msk [vmem:[#allocation2] sm:$0xff] %vm24_vm0, %v73_v0  ;;  %v29_v3 = vadd.f32 %v27_v2, %v26_v1 }
  0x14   :  { %30 = vadd.xlane.f32.xlu0 %v29_v3 }
  0x19   :  { %v28_v4 = vld [vmem:[#allocation2] sm:$0xff] }
  0xa1   :  { %v31_v5 = vpop.xlane.xlu0 %30 }
  0xa2   :  { %v32_v6 = vadd.f32 %v31_v5, %v28_v4 }
  0xa4   :  { %34 = vst.msk [vmem:[#allocation2] sm:$0xff] %vm24_vm0, %v32_v6 }
  0xab   :  { %v38_v7 = vld [vmem:[#allocation2] sm:$0xff] }
  0xac   :  { %v39_v8 = vmul.f32 0.00390625, %v38_v7 }
  0xae   :  { %40 = vst.msk [vmem:[%s100_s1] sm:$0xff] %vm24_vm0, %v39_v8 }
  0xaf   :  { %45 = vsyncpa [#allocation4], 1 }

</bundles_post_ra>
